<compile_context>
chip_gen: v6e
topology: v6e:2x2x1
jax: 0.10.0
libtpu: 0.0.40
codegen_flags: <defaults>
</compile_context>

<pallas_src>
import math

import jax
import jax.numpy as jnp
from jax import lax
from jax.experimental import pallas as pl
from jax.experimental.pallas import tpu as pltpu


# 3x3 tap order matches a row-major flatten of the (3, 3) kernel window.
_TAPS = tuple((dh, dw) for dh in (-1, 0, 1) for dw in (-1, 0, 1))


def _make_kernel(H, W, nb, C1, C2, c1pg, c2pg):
    """Kernel factory; all geometry is static (baked into the traced program)."""
    HW = H * W

    def tap_masks():
        # "same"-padding validity masks, one (1, HW) f32 row per non-center tap,
        # generated in-kernel from iota compares (review item: drop the (9, HW)
        # resident mask array).  Row predicates need no div; column index uses a
        # bitwise AND when W is a power of two.
        pos = lax.broadcasted_iota(jnp.int32, (1, HW), 1)
        if W & (W - 1) == 0:
            col = jnp.bitwise_and(pos, W - 1)
        else:
            col = pos % W  # TODO(synk): vector int rem for non-pow2 W untested here.
        masks = {}
        for (dh, dw) in _TAPS:
            if dh == 0 and dw == 0:
                continue
            ok = jnp.ones((1, HW), jnp.bool_)
            if dh == -1:
                ok = jnp.logical_and(ok, pos >= W)              # h - 1 >= 0
            if dh == 1:
                ok = jnp.logical_and(ok, pos < (H - 1) * W)     # h + 1 <= H-1
            if dw == -1:
                ok = jnp.logical_and(ok, col >= 1)              # w - 1 >= 0
            if dw == 1:
                ok = jnp.logical_and(ok, col < W - 1)           # w + 1 <= W-1
            masks[(dh, dw)] = ok.astype(jnp.float32)
        return masks

    def shifted_tap(x, masks, dh, dw):
        # out[:, p] = x[:, p + dh*W + dw] for valid taps, else 0.  pltpu.roll
        # wraps around, but every wrapped lane has (h+dh, w+dw) out of the
        # image, so the mask multiply zeroes it (same semantics as zero pad).
        if dh == 0 and dw == 0:
            return x
        d = dh * W + dw
        rolled = pltpu.roll(x, shift=(-d) % HW, axis=1)
        return rolled * masks[(dh, dw)]

    if c1pg == 1:
        # Fast path (c2 % c1 == 0, incl. depthwise): each output channel reads
        # exactly one input channel -> no input replication.  One accumulator
        # chain per output-channel residue r in [0, c2pg).
        WS = 10                              # per-chain columns: 9 taps + bias
        nparts = 3 if c2pg == 1 else 2       # partial accumulators per chain

        def kernel(x_ref, w_ref, o_ref):
            # x_ref : (1, nb*C1, HW)   raw input rows, flat spatial in lanes
            # w_ref : (nb*C1, c2pg*10) BN-folded weights [9 taps | bias] per chain
            # o_ref : (1, nb*C2, HW)
            x = x_ref[0]                                          # (rows, HW)
            rows = nb * C1
            masks = tap_masks()

            # Partial accumulators; part 0 starts from the folded BN bias.
            parts = []
            for r in range(c2pg):
                b_col = w_ref[:, r * WS + 9: r * WS + 10]         # (rows, 1)
                p0 = jnp.broadcast_to(b_col, (rows, HW)).astype(jnp.float32)
                parts.append([p0] + [jnp.zeros((rows, HW), jnp.float32)
                                     for _ in range(nparts - 1)])

            for t, (dh, dw) in enumerate(_TAPS):
                s = shifted_tap(x, masks, dh, dw)                 # once, on raw rows
                for r in range(c2pg):
                    w_col = w_ref[:, r * WS + t: r * WS + t + 1]  # (rows, 1)
                    k = t % nparts
                    parts[r][k] = parts[r][k] + w_col * s         # 1 mul + 1 add

            ys = []
            for r in range(c2pg):
                acc = parts[r][0]
                for p in range(1, nparts):
                    acc = acc + parts[r][p]
                ys.append(acc * jax.nn.sigmoid(acc))              # SiLU

            if c2pg == 1:
                o_ref[0] = ys[0].astype(o_ref.dtype)
            else:
                # Interleave chain rows back into true output-channel order
                # (once per grid step; output store stays lane-dense).
                out_rows = []
                for i in range(nb):
                    for gi in range(C1):
                        for r in range(c2pg):
                            out_rows.append(ys[r][i * C1 + gi: i * C1 + gi + 1, :])
                o_ref[0] = jnp.concatenate(out_rows, axis=0).astype(o_ref.dtype)

        return kernel

    # General grouped fallback (c1pg > 1): gather per-output-channel input rows
    # once per in-group channel j, then roll + mask + MAC with partial accs.
    def kernel(x_ref, w_ref, o_ref):
        # x_ref : (1, nb*C1, HW)
        # w_ref : (nb*C2, c1pg*9 + 1)
        # o_ref : (1, nb*C2, HW)
        x = x_ref[0]
        rows = nb * C2
        masks = tap_masks()
        nparts = 3

        b_col = w_ref[:, c1pg * 9: c1pg * 9 + 1]
        parts = [jnp.broadcast_to(b_col, (rows, HW)).astype(jnp.float32)]
        parts += [jnp.zeros((rows, HW), jnp.float32) for _ in range(nparts - 1)]

        for j in range(c1pg):
            sel = []
            for i in range(nb):
                for c in range(C2):
                    base = i * C1 + (c // c2pg) * c1pg + j
                    sel.append(x[base:base + 1])
            xs = jnp.concatenate(sel, axis=0)                     # (rows, HW)
            for t, (dh, dw) in enumerate(_TAPS):
                s = shifted_tap(xs, masks, dh, dw)
                w_col = w_ref[:, j * 9 + t: j * 9 + t + 1]
                k = (j * 9 + t) % nparts
                parts[k] = parts[k] + w_col * s

        acc = parts[0]
        for p in range(1, nparts):
            acc = acc + parts[p]
        y = acc * jax.nn.sigmoid(acc)
        o_ref[0] = y.astype(o_ref.dtype)

    return kernel


def _pick_nb(N, C1):
    """Images per grid step: fill the 8-sublane vreg height with nb*C1 rows."""
    best = 1
    for cand in range(1, N + 1):
        if N % cand == 0 and cand * C1 <= 8:
            best = cand
    return best


def frepconv_forward(x_nchw, w_pt, gamma, beta, running_mean, running_var,
                     *, groups, eps=1e-5):
    """x_nchw: (N, C1, H, W); w_pt: (C2, C1//groups, 3, 3) (PyTorch OIHW, grouped)."""
    N, C1, H, W = x_nchw.shape
    C2 = w_pt.shape[0]
    c1pg, c2pg = C1 // groups, C2 // groups
    HW = H * W
    nb = _pick_nb(N, C1)     # NOTE(v7x): prefer nb = N//2 to keep grid >= 2 on 2-TC parts.
    ng = N // nb

    # Fold eval-mode BN scale into the conv weight; keep only the bias.
    scale = gamma / jnp.sqrt(running_var + eps)                          # (C2,)
    bias = (beta - running_mean * scale).astype(jnp.float32)             # (C2,)
    w_fold = (w_pt * scale[:, None, None, None]).astype(jnp.float32)     # (C2, c1pg, 3, 3)

    # Pack weights + bias into ONE small lane-dense tile (single DMA, resident).
    if c1pg == 1:
        w9 = w_fold.reshape(C2, 9)
        blocks = []
        for r in range(c2pg):
            blocks.append(jnp.concatenate([w9[r::c2pg, :], bias[r::c2pg, None]], axis=1))
        w_img = jnp.concatenate(blocks, axis=1)                           # (C1, c2pg*10)
        w_tile = jnp.tile(w_img, (nb, 1))                                 # (nb*C1, c2pg*10)
    else:
        w_img = jnp.concatenate([w_fold.reshape(C2, c1pg * 9), bias[:, None]], axis=1)
        w_tile = jnp.tile(w_img, (nb, 1))                                 # (nb*C2, c1pg*9+1)

    # NCHW kept end-to-end; merging (nb, C1) and flattening H*W are contiguous reshapes.
    x_r = x_nchw.reshape(ng, nb * C1, HW)

    flops = N * C2 * HW * (2 * 9 * c1pg + 6)
    transcendentals = N * C2 * HW
    bytes_accessed = 4 * (x_r.size + w_tile.size + ng * nb * C2 * HW)

    out_flat = pl.pallas_call(
        _make_kernel(H, W, nb, C1, C2, c1pg, c2pg),
        out_shape=jax.ShapeDtypeStruct((ng, nb * C2, HW), x_nchw.dtype),
        grid_spec=pltpu.PrefetchScalarGridSpec(
            num_scalar_prefetch=0,
            grid=(ng,),
            in_specs=[
                pl.BlockSpec((1, nb * C1, HW), lambda n: (n, 0, 0)),
                pl.BlockSpec(w_tile.shape, lambda n: (0, 0)),   # resident across the grid
            ],
            out_specs=pl.BlockSpec((1, nb * C2, HW), lambda n: (n, 0, 0)),
        ),
        compiler_params=pltpu.CompilerParams(dimension_semantics=("parallel",)),
        cost_estimate=pl.CostEstimate(flops=flops,
                                      transcendentals=transcendentals,
                                      bytes_accessed=bytes_accessed),
    )(x_r, w_tile)

    return out_flat.reshape(N, C2, H, W)        # contiguous reshape, stays NCHW


if __name__ == "__main__":
    # FRepConv(c1=4, c2=8): FConv uses groups = gcd(4, 8) = 4  (c1pg=1, c2pg=2).
    N, C1, C2, H, W = 2, 4, 8, 16, 16
    G = math.gcd(C1, C2)

    key = jax.random.PRNGKey(0)
    kx, kw, kg, kb, km, kv = jax.random.split(key, 6)

    x = jax.random.normal(kx, (N, C1, H, W), jnp.float32)
    w = jax.random.normal(kw, (C2, C1 // G, 3, 3), jnp.float32) * 0.1
    gamma = jax.random.normal(kg, (C2,), jnp.float32) * 0.1 + 1.0
    beta = jax.random.normal(kb, (C2,), jnp.float32) * 0.1
    running_mean = jax.random.normal(km, (C2,), jnp.float32) * 0.1
    running_var = jax.random.uniform(kv, (C2,), jnp.float32, 0.5, 1.5)
    eps = 1e-5

    out = frepconv_forward(x, w, gamma, beta, running_mean, running_var,
                           groups=G, eps=eps)
    out = jax.block_until_ready(out)

    # Pure-JAX reference (grouped conv + eval-mode BN + SiLU).
    ref = lax.conv_general_dilated(
        x, w, window_strides=(1, 1), padding=((1, 1), (1, 1)),
        dimension_numbers=("NCHW", "OIHW", "NCHW"), feature_group_count=G)
    s = (gamma / jnp.sqrt(running_var + eps))[None, :, None, None]
    b = (beta - running_mean * gamma / jnp.sqrt(running_var + eps))[None, :, None, None]
    ref = ref * s + b
    ref = ref * jax.nn.sigmoid(ref)

    assert out.shape == (N, C2, H, W)
    assert jnp.allclose(out, ref, atol=1e-4, rtol=1e-4)
    print("KERNEL_OK")
</pallas_src>

<mosaic_0001>
module attributes {stable_mosaic.version = 11 : i64} {
  func.func @kernel(%arg0: i32, %arg1: memref<1x8x256xf32, #tpu.memory_space<vmem>>, %arg2: memref<8x20xf32, #tpu.memory_space<vmem>>, %arg3: memref<1x16x256xf32, #tpu.memory_space<vmem>>) attributes {dimension_semantics = [#tpu.dimension_semantics<parallel>], iteration_bounds = array<i64: 1>, scalar_prefetch = 0 : i64, scratch_operands = 0 : i64, tpu.core_type = #tpu.core_type<tc>, window_params = [{transform_indices = @transform_0, window_bounds = array<i64: 1, 8, 256>}, {pipeline_mode = #tpu.pipeline_mode<synchronous>, transform_indices = @transform_1, window_bounds = array<i64: 8, 20>}, {transform_indices = @transform_2, window_bounds = array<i64: 1, 16, 256>}]} {
    %c0 = arith.constant 0 : index
    %c0_0 = arith.constant 0 : index
    %c0_1 = arith.constant 0 : index
    %0 = vector.load %arg1[%c0, %c0_0, %c0_1] : memref<1x8x256xf32, #tpu.memory_space<vmem>>, vector<1x8x256xf32>
    %1 = vector.shape_cast %0 : vector<1x8x256xf32> to vector<8x256xf32>
    %2 = tpu.iota {dimensions = array<i32: 1>} : vector<1x256xi32>
    %c15_i32 = arith.constant 15 : i32
    %3 = vector.broadcast %c15_i32 : i32 to vector<1x256xi32>
    %4 = arith.andi %2, %3 : vector<1x256xi32>
    %true = arith.constant true
    %5 = vector.broadcast %true : i1 to vector<1x256xi1>
    %c16_i32 = arith.constant 16 : i32
    %6 = vector.broadcast %c16_i32 : i32 to vector<1x256xi32>
    %7 = arith.cmpi sge, %2, %6 : vector<1x256xi32>
    %8 = arith.andi %5, %7 : vector<1x256xi1>
    %c1_i32 = arith.constant 1 : i32
    %9 = vector.broadcast %c1_i32 : i32 to vector<1x256xi32>
    %10 = arith.cmpi sge, %4, %9 : vector<1x256xi32>
    %11 = arith.andi %8, %10 : vector<1x256xi1>
    %12 = arith.extui %11 : vector<1x256xi1> to vector<1x256xi32>
    %13 = arith.sitofp %12 : vector<1x256xi32> to vector<1x256xf32>
    %true_2 = arith.constant true
    %14 = vector.broadcast %true_2 : i1 to vector<1x256xi1>
    %c16_i32_3 = arith.constant 16 : i32
    %15 = vector.broadcast %c16_i32_3 : i32 to vector<1x256xi32>
    %16 = arith.cmpi sge, %2, %15 : vector<1x256xi32>
    %17 = arith.andi %14, %16 : vector<1x256xi1>
    %18 = arith.extui %17 : vector<1x256xi1> to vector<1x256xi32>
    %19 = arith.sitofp %18 : vector<1x256xi32> to vector<1x256xf32>
    %true_4 = arith.constant true
    %20 = vector.broadcast %true_4 : i1 to vector<1x256xi1>
    %c16_i32_5 = arith.constant 16 : i32
    %21 = vector.broadcast %c16_i32_5 : i32 to vector<1x256xi32>
    %22 = arith.cmpi sge, %2, %21 : vector<1x256xi32>
    %23 = arith.andi %20, %22 : vector<1x256xi1>
    %c15_i32_6 = arith.constant 15 : i32
    %24 = vector.broadcast %c15_i32_6 : i32 to vector<1x256xi32>
    %25 = arith.cmpi slt, %4, %24 : vector<1x256xi32>
    %26 = arith.andi %23, %25 : vector<1x256xi1>
    %27 = arith.extui %26 : vector<1x256xi1> to vector<1x256xi32>
    %28 = arith.sitofp %27 : vector<1x256xi32> to vector<1x256xf32>
    %true_7 = arith.constant true
    %29 = vector.broadcast %true_7 : i1 to vector<1x256xi1>
    %c1_i32_8 = arith.constant 1 : i32
    %30 = vector.broadcast %c1_i32_8 : i32 to vector<1x256xi32>
    %31 = arith.cmpi sge, %4, %30 : vector<1x256xi32>
    %32 = arith.andi %29, %31 : vector<1x256xi1>
    %33 = arith.extui %32 : vector<1x256xi1> to vector<1x256xi32>
    %34 = arith.sitofp %33 : vector<1x256xi32> to vector<1x256xf32>
    %true_9 = arith.constant true
    %35 = vector.broadcast %true_9 : i1 to vector<1x256xi1>
    %c15_i32_10 = arith.constant 15 : i32
    %36 = vector.broadcast %c15_i32_10 : i32 to vector<1x256xi32>
    %37 = arith.cmpi slt, %4, %36 : vector<1x256xi32>
    %38 = arith.andi %35, %37 : vector<1x256xi1>
    %39 = arith.extui %38 : vector<1x256xi1> to vector<1x256xi32>
    %40 = arith.sitofp %39 : vector<1x256xi32> to vector<1x256xf32>
    %true_11 = arith.constant true
    %41 = vector.broadcast %true_11 : i1 to vector<1x256xi1>
    %c240_i32 = arith.constant 240 : i32
    %42 = vector.broadcast %c240_i32 : i32 to vector<1x256xi32>
    %43 = arith.cmpi slt, %2, %42 : vector<1x256xi32>
    %44 = arith.andi %41, %43 : vector<1x256xi1>
    %c1_i32_12 = arith.constant 1 : i32
    %45 = vector.broadcast %c1_i32_12 : i32 to vector<1x256xi32>
    %46 = arith.cmpi sge, %4, %45 : vector<1x256xi32>
    %47 = arith.andi %44, %46 : vector<1x256xi1>
    %48 = arith.extui %47 : vector<1x256xi1> to vector<1x256xi32>
    %49 = arith.sitofp %48 : vector<1x256xi32> to vector<1x256xf32>
    %true_13 = arith.constant true
    %50 = vector.broadcast %true_13 : i1 to vector<1x256xi1>
    %c240_i32_14 = arith.constant 240 : i32
    %51 = vector.broadcast %c240_i32_14 : i32 to vector<1x256xi32>
    %52 = arith.cmpi slt, %2, %51 : vector<1x256xi32>
    %53 = arith.andi %50, %52 : vector<1x256xi1>
    %54 = arith.extui %53 : vector<1x256xi1> to vector<1x256xi32>
    %55 = arith.sitofp %54 : vector<1x256xi32> to vector<1x256xf32>
    %true_15 = arith.constant true
    %56 = vector.broadcast %true_15 : i1 to vector<1x256xi1>
    %c240_i32_16 = arith.constant 240 : i32
    %57 = vector.broadcast %c240_i32_16 : i32 to vector<1x256xi32>
    %58 = arith.cmpi slt, %2, %57 : vector<1x256xi32>
    %59 = arith.andi %56, %58 : vector<1x256xi1>
    %c15_i32_17 = arith.constant 15 : i32
    %60 = vector.broadcast %c15_i32_17 : i32 to vector<1x256xi32>
    %61 = arith.cmpi slt, %4, %60 : vector<1x256xi32>
    %62 = arith.andi %59, %61 : vector<1x256xi1>
    %63 = arith.extui %62 : vector<1x256xi1> to vector<1x256xi32>
    %64 = arith.sitofp %63 : vector<1x256xi32> to vector<1x256xf32>
    %c0_18 = arith.constant 0 : index
    %c9 = arith.constant 9 : index
    %65 = vector.load %arg2[%c0_18, %c9] : memref<8x20xf32, #tpu.memory_space<vmem>>, vector<8x1xf32>
    %66 = vector.shape_cast %65 : vector<8x1xf32> to vector<8x1xf32>
    %67 = vector.broadcast %66 : vector<8x1xf32> to vector<8x256xf32>
    %cst = arith.constant 0.000000e+00 : f32
    %68 = vector.broadcast %cst : f32 to vector<8x256xf32>
    %c0_19 = arith.constant 0 : index
    %c19 = arith.constant 19 : index
    %69 = vector.load %arg2[%c0_19, %c19] : memref<8x20xf32, #tpu.memory_space<vmem>>, vector<8x1xf32>
    %70 = vector.shape_cast %69 : vector<8x1xf32> to vector<8x1xf32>
    %71 = vector.broadcast %70 : vector<8x1xf32> to vector<8x256xf32>
    %cst_20 = arith.constant 0.000000e+00 : f32
    %72 = vector.broadcast %cst_20 : f32 to vector<8x256xf32>
    %c17_i32 = arith.constant 17 : i32
    %73 = tpu.dynamic_rotate %1 by %c17_i32 dim 1 : vector<8x256xf32>, i32 -> vector<8x256xf32>
    %74 = vector.broadcast %13 : vector<1x256xf32> to vector<8x256xf32>
    %75 = arith.mulf %73, %74 : vector<8x256xf32>
    %c0_21 = arith.constant 0 : index
    %c0_22 = arith.constant 0 : index
    %76 = vector.load %arg2[%c0_21, %c0_22] : memref<8x20xf32, #tpu.memory_space<vmem>>, vector<8x1xf32>
    %77 = vector.broadcast %76 : vector<8x1xf32> to vector<8x256xf32>
    %78 = arith.mulf %77, %75 : vector<8x256xf32>
    %79 = arith.addf %67, %78 : vector<8x256xf32>
    %c0_23 = arith.constant 0 : index
    %c10 = arith.constant 10 : index
    %80 = vector.load %arg2[%c0_23, %c10] : memref<8x20xf32, #tpu.memory_space<vmem>>, vector<8x1xf32>
    %81 = vector.broadcast %80 : vector<8x1xf32> to vector<8x256xf32>
    %82 = arith.mulf %81, %75 : vector<8x256xf32>
    %83 = arith.addf %71, %82 : vector<8x256xf32>
    %c16_i32_24 = arith.constant 16 : i32
    %84 = tpu.dynamic_rotate %1 by %c16_i32_24 dim 1 : vector<8x256xf32>, i32 -> vector<8x256xf32>
    %85 = vector.broadcast %19 : vector<1x256xf32> to vector<8x256xf32>
    %86 = arith.mulf %84, %85 : vector<8x256xf32>
    %c0_25 = arith.constant 0 : index
    %c1 = arith.constant 1 : index
    %87 = vector.load %arg2[%c0_25, %c1] : memref<8x20xf32, #tpu.memory_space<vmem>>, vector<8x1xf32>
    %88 = vector.broadcast %87 : vector<8x1xf32> to vector<8x256xf32>
    %89 = arith.mulf %88, %86 : vector<8x256xf32>
    %90 = arith.addf %68, %89 : vector<8x256xf32>
    %c0_26 = arith.constant 0 : index
    %c11 = arith.constant 11 : index
    %91 = vector.load %arg2[%c0_26, %c11] : memref<8x20xf32, #tpu.memory_space<vmem>>, vector<8x1xf32>
    %92 = vector.broadcast %91 : vector<8x1xf32> to vector<8x256xf32>
    %93 = arith.mulf %92, %86 : vector<8x256xf32>
    %94 = arith.addf %72, %93 : vector<8x256xf32>
    %c15_i32_27 = arith.constant 15 : i32
    %95 = tpu.dynamic_rotate %1 by %c15_i32_27 dim 1 : vector<8x256xf32>, i32 -> vector<8x256xf32>
    %96 = vector.broadcast %28 : vector<1x256xf32> to vector<8x256xf32>
    %97 = arith.mulf %95, %96 : vector<8x256xf32>
    %c0_28 = arith.constant 0 : index
    %c2 = arith.constant 2 : index
    %98 = vector.load %arg2[%c0_28, %c2] : memref<8x20xf32, #tpu.memory_space<vmem>>, vector<8x1xf32>
    %99 = vector.broadcast %98 : vector<8x1xf32> to vector<8x256xf32>
    %100 = arith.mulf %99, %97 : vector<8x256xf32>
    %101 = arith.addf %79, %100 : vector<8x256xf32>
    %c0_29 = arith.constant 0 : index
    %c12 = arith.constant 12 : index
    %102 = vector.load %arg2[%c0_29, %c12] : memref<8x20xf32, #tpu.memory_space<vmem>>, vector<8x1xf32>
    %103 = vector.broadcast %102 : vector<8x1xf32> to vector<8x256xf32>
    %104 = arith.mulf %103, %97 : vector<8x256xf32>
    %105 = arith.addf %83, %104 : vector<8x256xf32>
    %c1_i32_30 = arith.constant 1 : i32
    %106 = tpu.dynamic_rotate %1 by %c1_i32_30 dim 1 : vector<8x256xf32>, i32 -> vector<8x256xf32>
    %107 = vector.broadcast %34 : vector<1x256xf32> to vector<8x256xf32>
    %108 = arith.mulf %106, %107 : vector<8x256xf32>
    %c0_31 = arith.constant 0 : index
    %c3 = arith.constant 3 : index
    %109 = vector.load %arg2[%c0_31, %c3] : memref<8x20xf32, #tpu.memory_space<vmem>>, vector<8x1xf32>
    %110 = vector.broadcast %109 : vector<8x1xf32> to vector<8x256xf32>
    %111 = arith.mulf %110, %108 : vector<8x256xf32>
    %112 = arith.addf %90, %111 : vector<8x256xf32>
    %c0_32 = arith.constant 0 : index
    %c13 = arith.constant 13 : index
    %113 = vector.load %arg2[%c0_32, %c13] : memref<8x20xf32, #tpu.memory_space<vmem>>, vector<8x1xf32>
    %114 = vector.broadcast %113 : vector<8x1xf32> to vector<8x256xf32>
    %115 = arith.mulf %114, %108 : vector<8x256xf32>
    %116 = arith.addf %94, %115 : vector<8x256xf32>
    %c0_33 = arith.constant 0 : index
    %c4 = arith.constant 4 : index
    %117 = vector.load %arg2[%c0_33, %c4] : memref<8x20xf32, #tpu.memory_space<vmem>>, vector<8x1xf32>
    %118 = vector.broadcast %117 : vector<8x1xf32> to vector<8x256xf32>
    %119 = arith.mulf %118, %1 : vector<8x256xf32>
    %120 = arith.addf %101, %119 : vector<8x256xf32>
    %c0_34 = arith.constant 0 : index
    %c14 = arith.constant 14 : index
    %121 = vector.load %arg2[%c0_34, %c14] : memref<8x20xf32, #tpu.memory_space<vmem>>, vector<8x1xf32>
    %122 = vector.broadcast %121 : vector<8x1xf32> to vector<8x256xf32>
    %123 = arith.mulf %122, %1 : vector<8x256xf32>
    %124 = arith.addf %105, %123 : vector<8x256xf32>
    %c255_i32 = arith.constant 255 : i32
    %125 = tpu.dynamic_rotate %1 by %c255_i32 dim 1 : vector<8x256xf32>, i32 -> vector<8x256xf32>
    %126 = vector.broadcast %40 : vector<1x256xf32> to vector<8x256xf32>
    %127 = arith.mulf %125, %126 : vector<8x256xf32>
    %c0_35 = arith.constant 0 : index
    %c5 = arith.constant 5 : index
    %128 = vector.load %arg2[%c0_35, %c5] : memref<8x20xf32, #tpu.memory_space<vmem>>, vector<8x1xf32>
    %129 = vector.broadcast %128 : vector<8x1xf32> to vector<8x256xf32>
    %130 = arith.mulf %129, %127 : vector<8x256xf32>
    %131 = arith.addf %112, %130 : vector<8x256xf32>
    %c0_36 = arith.constant 0 : index
    %c15 = arith.constant 15 : index
    %132 = vector.load %arg2[%c0_36, %c15] : memref<8x20xf32, #tpu.memory_space<vmem>>, vector<8x1xf32>
    %133 = vector.broadcast %132 : vector<8x1xf32> to vector<8x256xf32>
    %134 = arith.mulf %133, %127 : vector<8x256xf32>
    %135 = arith.addf %116, %134 : vector<8x256xf32>
    %c241_i32 = arith.constant 241 : i32
    %136 = tpu.dynamic_rotate %1 by %c241_i32 dim 1 : vector<8x256xf32>, i32 -> vector<8x256xf32>
    %137 = vector.broadcast %49 : vector<1x256xf32> to vector<8x256xf32>
    %138 = arith.mulf %136, %137 : vector<8x256xf32>
    %c0_37 = arith.constant 0 : index
    %c6 = arith.constant 6 : index
    %139 = vector.load %arg2[%c0_37, %c6] : memref<8x20xf32, #tpu.memory_space<vmem>>, vector<8x1xf32>
    %140 = vector.broadcast %139 : vector<8x1xf32> to vector<8x256xf32>
    %141 = arith.mulf %140, %138 : vector<8x256xf32>
    %142 = arith.addf %120, %141 : vector<8x256xf32>
    %c0_38 = arith.constant 0 : index
    %c16 = arith.constant 16 : index
    %143 = vector.load %arg2[%c0_38, %c16] : memref<8x20xf32, #tpu.memory_space<vmem>>, vector<8x1xf32>
    %144 = vector.broadcast %143 : vector<8x1xf32> to vector<8x256xf32>
    %145 = arith.mulf %144, %138 : vector<8x256xf32>
    %146 = arith.addf %124, %145 : vector<8x256xf32>
    %c240_i32_39 = arith.constant 240 : i32
    %147 = tpu.dynamic_rotate %1 by %c240_i32_39 dim 1 : vector<8x256xf32>, i32 -> vector<8x256xf32>
    %148 = vector.broadcast %55 : vector<1x256xf32> to vector<8x256xf32>
    %149 = arith.mulf %147, %148 : vector<8x256xf32>
    %c0_40 = arith.constant 0 : index
    %c7 = arith.constant 7 : index
    %150 = vector.load %arg2[%c0_40, %c7] : memref<8x20xf32, #tpu.memory_space<vmem>>, vector<8x1xf32>
    %151 = vector.broadcast %150 : vector<8x1xf32> to vector<8x256xf32>
    %152 = arith.mulf %151, %149 : vector<8x256xf32>
    %153 = arith.addf %131, %152 : vector<8x256xf32>
    %c0_41 = arith.constant 0 : index
    %c17 = arith.constant 17 : index
    %154 = vector.load %arg2[%c0_41, %c17] : memref<8x20xf32, #tpu.memory_space<vmem>>, vector<8x1xf32>
    %155 = vector.broadcast %154 : vector<8x1xf32> to vector<8x256xf32>
    %156 = arith.mulf %155, %149 : vector<8x256xf32>
    %157 = arith.addf %135, %156 : vector<8x256xf32>
    %c239_i32 = arith.constant 239 : i32
    %158 = tpu.dynamic_rotate %1 by %c239_i32 dim 1 : vector<8x256xf32>, i32 -> vector<8x256xf32>
    %159 = vector.broadcast %64 : vector<1x256xf32> to vector<8x256xf32>
    %160 = arith.mulf %158, %159 : vector<8x256xf32>
    %c0_42 = arith.constant 0 : index
    %c8 = arith.constant 8 : index
    %161 = vector.load %arg2[%c0_42, %c8] : memref<8x20xf32, #tpu.memory_space<vmem>>, vector<8x1xf32>
    %162 = vector.broadcast %161 : vector<8x1xf32> to vector<8x256xf32>
    %163 = arith.mulf %162, %160 : vector<8x256xf32>
    %164 = arith.addf %142, %163 : vector<8x256xf32>
    %c0_43 = arith.constant 0 : index
    %c18 = arith.constant 18 : index
    %165 = vector.load %arg2[%c0_43, %c18] : memref<8x20xf32, #tpu.memory_space<vmem>>, vector<8x1xf32>
    %166 = vector.broadcast %165 : vector<8x1xf32> to vector<8x256xf32>
    %167 = arith.mulf %166, %160 : vector<8x256xf32>
    %168 = arith.addf %146, %167 : vector<8x256xf32>
    %169 = arith.addf %164, %153 : vector<8x256xf32>
    %170 = arith.negf %169 : vector<8x256xf32>
    %171 = math.exp %170 : vector<8x256xf32>
    %cst_44 = arith.constant 1.000000e+00 : f32
    %172 = vector.broadcast %cst_44 : f32 to vector<8x256xf32>
    %173 = arith.addf %172, %171 : vector<8x256xf32>
    %174 = arith.divf %172, %173 : vector<8x256xf32>
    %175 = arith.mulf %169, %174 : vector<8x256xf32>
    %176 = arith.addf %168, %157 : vector<8x256xf32>
    %177 = arith.negf %176 : vector<8x256xf32>
    %178 = math.exp %177 : vector<8x256xf32>
    %cst_45 = arith.constant 1.000000e+00 : f32
    %179 = vector.broadcast %cst_45 : f32 to vector<8x256xf32>
    %180 = arith.addf %179, %178 : vector<8x256xf32>
    %181 = arith.divf %179, %180 : vector<8x256xf32>
    %182 = arith.mulf %176, %181 : vector<8x256xf32>
    %183 = vector.extract_strided_slice %175 {offsets = [0, 0], sizes = [1, 256], strides = [1, 1]} : vector<8x256xf32> to vector<1x256xf32>
    %184 = vector.extract_strided_slice %182 {offsets = [0, 0], sizes = [1, 256], strides = [1, 1]} : vector<8x256xf32> to vector<1x256xf32>
    %185 = vector.extract_strided_slice %175 {offsets = [1, 0], sizes = [1, 256], strides = [1, 1]} : vector<8x256xf32> to vector<1x256xf32>
    %186 = vector.extract_strided_slice %182 {offsets = [1, 0], sizes = [1, 256], strides = [1, 1]} : vector<8x256xf32> to vector<1x256xf32>
    %187 = vector.extract_strided_slice %175 {offsets = [2, 0], sizes = [1, 256], strides = [1, 1]} : vector<8x256xf32> to vector<1x256xf32>
    %188 = vector.extract_strided_slice %182 {offsets = [2, 0], sizes = [1, 256], strides = [1, 1]} : vector<8x256xf32> to vector<1x256xf32>
    %189 = vector.extract_strided_slice %175 {offsets = [3, 0], sizes = [1, 256], strides = [1, 1]} : vector<8x256xf32> to vector<1x256xf32>
    %190 = vector.extract_strided_slice %182 {offsets = [3, 0], sizes = [1, 256], strides = [1, 1]} : vector<8x256xf32> to vector<1x256xf32>
    %191 = vector.extract_strided_slice %175 {offsets = [4, 0], sizes = [1, 256], strides = [1, 1]} : vector<8x256xf32> to vector<1x256xf32>
    %192 = vector.extract_strided_slice %182 {offsets = [4, 0], sizes = [1, 256], strides = [1, 1]} : vector<8x256xf32> to vector<1x256xf32>
    %193 = vector.extract_strided_slice %175 {offsets = [5, 0], sizes = [1, 256], strides = [1, 1]} : vector<8x256xf32> to vector<1x256xf32>
    %194 = vector.extract_strided_slice %182 {offsets = [5, 0], sizes = [1, 256], strides = [1, 1]} : vector<8x256xf32> to vector<1x256xf32>
    %195 = vector.extract_strided_slice %175 {offsets = [6, 0], sizes = [1, 256], strides = [1, 1]} : vector<8x256xf32> to vector<1x256xf32>
    %196 = vector.extract_strided_slice %182 {offsets = [6, 0], sizes = [1, 256], strides = [1, 1]} : vector<8x256xf32> to vector<1x256xf32>
    %197 = vector.extract_strided_slice %175 {offsets = [7, 0], sizes = [1, 256], strides = [1, 1]} : vector<8x256xf32> to vector<1x256xf32>
    %198 = vector.extract_strided_slice %182 {offsets = [7, 0], sizes = [1, 256], strides = [1, 1]} : vector<8x256xf32> to vector<1x256xf32>
    %199 = tpu.concatenate %183, %184, %185, %186, %187, %188, %189, %190, %191, %192, %193, %194, %195, %196, %197, %198 in 0 : vector<1x256xf32>, vector<1x256xf32>, vector<1x256xf32>, vector<1x256xf32>, vector<1x256xf32>, vector<1x256xf32>, vector<1x256xf32>, vector<1x256xf32>, vector<1x256xf32>, vector<1x256xf32>, vector<1x256xf32>, vector<1x256xf32>, vector<1x256xf32>, vector<1x256xf32>, vector<1x256xf32>, vector<1x256xf32> -> vector<16x256xf32>
    %c0_46 = arith.constant 0 : index
    %c0_47 = arith.constant 0 : index
    %c0_48 = arith.constant 0 : index
    %200 = vector.load %arg3[%c0_46, %c0_47, %c0_48] : memref<1x16x256xf32, #tpu.memory_space<vmem>>, vector<1x16x256xf32>
    %201 = vector.shape_cast %200 : vector<1x16x256xf32> to vector<16x256xf32>
    %202 = vector.shape_cast %199 : vector<16x256xf32> to vector<1x16x256xf32>
    tpu.vector_store %arg3[%c0_46, %c0_47, %c0_48], %202 {strides = array<i32>} : memref<1x16x256xf32, #tpu.memory_space<vmem>>, vector<1x16x256xf32>,
    return
  }
  func.func @transform_0(%arg0: i32) -> (i32, i32, i32) {
    %c0_i32 = arith.constant 0 : i32
    %c0_i32_0 = arith.constant 0 : i32
    %c0_i32_1 = arith.constant 0 : i32
    return %arg0, %c0_i32, %c0_i32_0 : i32, i32, i32
  }
  func.func @transform_1(%arg0: i32) -> (i32, i32) {
    %c0_i32 = arith.constant 0 : i32
    %c0_i32_0 = arith.constant 0 : i32
    %c0_i32_1 = arith.constant 0 : i32
    return %c0_i32, %c0_i32_0 : i32, i32
  }
  func.func @transform_2(%arg0: i32) -> (i32, i32, i32) {
    %c0_i32 = arith.constant 0 : i32
    %c0_i32_0 = arith.constant 0 : i32
    %c0_i32_1 = arith.constant 0 : i32
    return %arg0, %c0_i32, %c0_i32_0 : i32, i32, i32
  }
}

</mosaic_0001>

<bundles_post_ra>
// kernel: tpu_custom_call.1
= control target key start
LH: loop header
LB: loop body
LE: loop exit
PB: predicated region body
PF: predicated region fallthrough
CT: control target
= control target key end

     0   :  { %7 = vsyncpa [#allocation3], 0  ;;  %s926_s0 = inlined_call_operand.hbm [shape: f32[1,8,256], index: 0, kind: input, shape index: {}]   ;;  %s927_s1 = inlined_call_operand.hbm [shape: f32[8,20], index: 1, kind: input, shape index: {}]   ;;  %s928_s2 = inlined_call_operand.hbm [shape: f32[1,16,256], index: 2, kind: output, shape index: {}]  }
   0x1   :  { %8 = vsyncpa [#allocation6], 0 }
   0x2   :  { %9 = vsyncpa [#allocation4], 0  ;;  %s619_s9 = smov [#allocation2]   ;;  %s620_s11 = smov [#allocation5]  }
   0x3   :  { %s16_s10 = sshll.u32 %s619_s9, 4  ;;  %s26_s12 = sshll.u32 %s620_s11, 4  ;;  %s17_s10 = int_to_ptr.vmem [resolvable:$true] %s16_s10  ;;  %s27_s12 = int_to_ptr.vmem [resolvable:$true] %s26_s12 }
   0x4   :  { %s561_s13 = scalar_lea.vmem %s17_s10, 256  ;;  %p566_p1 = scmp.lt.s32.totalorder %s17_s10, %s17_s10 }
   0x5   :  { %p562_p0 = scmp.ne.s32.totalorder %s17_s10, %s561_s13  ;;  %p567_p2 = scmp.lt.s32.totalorder %s561_s13, %s561_s13 }
   0x7   :  { %p568_p3 = por %p567_p2, %p566_p1 }
   0x9   :  { %p569_p4 = pnand %p568_p3, %p562_p0 }
   0xb   :  { %572 = shalt.err (!%p569_p4)
}
   0xc   :  { %19 = dma.hbm_to_vmem [thread:$0]  %s926_s0, 256, %s17_s10, [#allocation3]  }
   0xd   :  { %s581_s16 = scalar_lea.vmem %s27_s12, 128  ;;  %p586_p6 = scmp.lt.s32.totalorder %s27_s12, %s27_s12 }
   0xe   :  { %p582_p5 = scmp.ne.s32.totalorder %s27_s12, %s581_s16  ;;  %p587_p7 = scmp.lt.s32.totalorder %s581_s16, %s581_s16 }
  0x10   :  { %p588_p8 = por %p587_p7, %p586_p6 }
  0x12   :  { %p589_p9 = pnand %p588_p8, %p582_p5 }
  0x14   :  { %592 = shalt.err (!%p589_p9)
}
  0x15   :  { %29 = dma.hbm_to_vmem [thread:$0]  %s927_s1, 128, %s27_s12, [#allocation6]  }
  0x16   :  { %613 = dma.done.wait [#allocation3], 256  }
  0x17   :  { %614 = vsyncadd [#allocation3], 4294967040 }
  0x18   :  { %615 = dma.done.wait [#allocation6], 128  }
  0x19   :  { %616 = vsyncadd [#allocation6], 4294967168  ;;  %v621_v0 = vmov 0   ;;  %v622_v1 = vmov 9   ;;  %v673_v2 = vld [vmem:[#allocation5] sm:$0xff]  ;;  %v623_v3 = vmov 19   ;;  %v38_v23 = vlaneseq }
  0x1a   :  { %517 = vset.pattern.permute.xlu0 %v621_v0  ;;  %519 = vset.pattern.permute.xlu1 %v622_v1  ;;  %v624_v4 = vmov 10   ;;  %v679_v5 = vld [vmem:[#allocation2] sm:$0xff]  ;;  %v681_v6 = vld [vmem:[#allocation2 + $0x8] sm:$0xff]  ;;  %s625_s0 = smov 17   ;;  %v626_v7 = vmov 2   ;;  %v627_v8 = vmov 12  }
  0x1b   :  { %94 = vperm.xlu1 %519, %v673_v2   ;;  %111 = vperm.xlu0 %517, %v673_v2   ;;  %v628_v9 = vmov 1   ;;  %s629_s1 = smov 15   ;;  %v630_v10 = vmov 3   ;;  %v631_v11 = vmov 11   ;;  %v632_v12 = vmov 14   ;;  %s634_s19 = smov 1  }
  0x1c   :  { %v633_v13 = vmov 13   ;;  %v635_v14 = vmov 5   ;;  %v636_v15 = vmov 4   ;;  %v637_v16 = vmov 16   ;;  %s638_s20 = smov 16   ;;  %s640_s21 = smov 113  }
  0x1d   :  { %v639_v17 = vmov 15   ;;  %v641_v18 = vmov 7   ;;  %v642_v19 = vmov 18   ;;  %v643_v20 = vmov 6   ;;  %s644_s22 = smov 111   ;;  %s645_s23 = smov 127  }
  0x1e   :  { %v646_v21 = vmov 17   ;;  %v647_v22 = vmov 8   ;;  %s648_s24 = smov 112   ;;  %v717_v24 = vand.u32 127, %v38_v23  ;;  %v649_v34 = vmov 0.0   ;;  %s650_s25 = smov [#allocation7]  }
  0x1f   :  { %520 = vset.pattern.permute.xlu1 %v623_v3  ;;  %518 = vset.pattern.permute.xlu0 %v624_v4  ;;  %s453_s26 = sshll.u32 %s650_s25, 4  ;;  %s454_s26 = int_to_ptr.vmem [resolvable:$true] %s453_s26 }
  0x20   :  { %98 = vperm.xlu1 %520, %v673_v2   ;;  %119 = vperm.xlu0 %518, %v673_v2   ;;  %v720_v25 = vadd.s32 128, %v717_v24  ;;  %v41_v26 = vand.u32 15, %v717_v24  ;;  %vm43_vm0 = vcmp.ge.s32.totalorder %v717_v24, 16  ;;  %vm105_vm4 = vcmp.lt.s32.totalorder %v717_v24, 17  ;;  %s593_s27 = scalar_lea.vmem %s454_s26, 512  ;;  %p598_p11 = scmp.lt.s32.totalorder %s454_s26, %s454_s26 }
  0x21   :  { %vm155_vm8 = vcmp.lt.s32.totalorder %v717_v24, 15  ;;  %vm180_vm9 = vcmp.lt.s32.totalorder %v717_v24, 1  ;;  %vm130_vm11 = vcmp.lt.s32.totalorder %v717_v24, 16  ;;  %vm221_vm13 = vcmp.lt.s32.totalorder %v717_v24, 127  ;;  %p594_p10 = scmp.ne.s32.totalorder %s454_s26, %s593_s27  ;;  %p599_p12 = scmp.lt.s32.totalorder %s593_s27, %s593_s27 }
  0x22   :  { %v42_v29 = vand.u32 15, %v720_v25  ;;  %vm725_vm1 = vcmp.ge.s32.totalorder %v41_v26, 1  ;;  %vm747_vm5 = vcmp.lt.s32.totalorder %v41_v26, 15  ;;  %vm74_vm10 = vcmp.lt.s32.totalorder %v720_v25, 240 }
  0x23   :  { %vm47_vm3 = vmand %vm43_vm0, %vm725_vm1  ;;  %vm246_vm14 = vcmp.lt.s32.totalorder %v717_v24, 113  ;;  %p600_p13 = por %p599_p12, %p598_p11 }
  0x24   :  { %101 = vrot.lane.b32.xlu1 %v679_v5, %s625_s0  ;;  %103 = vrot.lane.b32.xlu0 %v681_v6, %s625_s0  ;;  %vm729_vm2 = vcmp.ge.s32.totalorder %v42_v29, 1  ;;  %v466_v35 = vsel %vm47_vm3, 1.0, %v649_v34  ;;  %vm753_vm6 = vcmp.lt.s32.totalorder %v42_v29, 15  ;;  %vm59_vm7 = vmand %vm43_vm0, %vm747_vm5  ;;  %vm412_vm3 = vcmask 1041408  }
  0x25   :  { %521 = vset.pattern.permute.xlu1 %v626_v7  ;;  %522 = vset.pattern.permute.xlu0 %v627_v8  ;;  %v742_v36 = vsel %vm729_vm2, 1.0, %v649_v34  ;;  %v469_v57 = vsel %vm59_vm7, 1.0, %v649_v34  ;;  %v766_v58 = vsel %vm753_vm6, 1.0, %v649_v34  ;;  %vm76_vm12 = vmand %vm74_vm10, %vm729_vm2  ;;  %vm409_vm2 = vcmask 1040384   ;;  %p601_p0 = pnand %p600_p13, %p594_p10 }
  0x26   :  { %vm86_vm15 = vmand %vm74_vm10, %vm753_vm6  ;;  %vm421_vm6 = vcmask 1044480   ;;  %vm424_vm7 = vcmask 1045504  }
  0x28   :  { %161 = vperm.xlu1 %521, %v673_v2   ;;  %169 = vperm.xlu0 %522, %v673_v2  }
  0x2c   :  { %523 = vset.pattern.permute.xlu1 %v628_v9  ;;  %151 = vrot.lane.b32.xlu0 %v679_v5, %s629_s1 }
  0x2d   :  { %136 = vperm.xlu1 %523, %v673_v2   ;;  %525 = vset.pattern.permute.xlu0 %v630_v10 }
  0x30   :  { %186 = vperm.xlu0 %525, %v673_v2  }
  0x31   :  { %524 = vset.pattern.permute.xlu1 %v631_v11 }
  0x32   :  { %144 = vperm.xlu1 %524, %v673_v2  }
  0x34   :  { %528 = vset.pattern.permute.xlu0 %v632_v12 }
  0x35   :  { %210 = vperm.xlu0 %528, %v673_v2  }
  0x36   :  { %153 = vrot.lane.b32.xlu1 %v681_v6, %s629_s1 }
  0x37   :  { %526 = vset.pattern.permute.xlu1 %v633_v13 }
  0x39   :  { %176 = vrot.lane.b32.xlu0 %v679_v5, %s634_s19 }
  0x3a   :  { %194 = vperm.xlu1 %526, %v673_v2   ;;  %529 = vset.pattern.permute.xlu0 %v635_v14 }
  0x3d   :  { %227 = vperm.xlu0 %529, %v673_v2  }
  0x3e   :  { %527 = vset.pattern.permute.xlu1 %v636_v15 }
  0x3f   :  { %202 = vperm.xlu1 %527, %v673_v2  }
  0x41   :  { %532 = vset.pattern.permute.xlu0 %v637_v16 }
  0x42   :  { %260 = vperm.xlu0 %532, %v673_v2  }
  0x43   :  { %126 = vrot.lane.b32.xlu1 %v679_v5, %s638_s20 }
  0x44   :  { %530 = vset.pattern.permute.xlu1 %v639_v17 }
  0x46   :  { %242 = vrot.lane.b32.xlu0 %v679_v5, %s640_s21 }
  0x47   :  { %128 = vrot.lane.b32.xlu1 %v681_v6, %s638_s20  ;;  %533 = vset.pattern.permute.xlu0 %v641_v18 }
  0x4a   :  { %277 = vperm.xlu0 %533, %v673_v2  }
  0x4b   :  { %178 = vrot.lane.b32.xlu1 %v681_v6, %s634_s19 }
  0x4e   :  { %536 = vset.pattern.permute.xlu0 %v642_v19 }
  0x4f   :  { %235 = vperm.xlu1 %530, %v673_v2   ;;  %310 = vperm.xlu0 %536, %v673_v2  }
  0x53   :  { %531 = vset.pattern.permute.xlu1 %v643_v20  ;;  %292 = vrot.lane.b32.xlu0 %v679_v5, %s644_s22 }
  0x54   :  { %252 = vperm.xlu1 %531, %v673_v2  }
  0x58   :  { %217 = vrot.lane.b32.xlu1 %v679_v5, %s645_s23 }
  0x59   :  { %534 = vset.pattern.permute.xlu1 %v646_v21 }
  0x5c   :  { %219 = vrot.lane.b32.xlu1 %v681_v6, %s645_s23 }
  0x60   :  { %244 = vrot.lane.b32.xlu1 %v681_v6, %s640_s21 }
  0x64   :  { %285 = vperm.xlu1 %534, %v673_v2  }
  0x68   :  { %535 = vset.pattern.permute.xlu1 %v647_v22 }
  0x69   :  { %302 = vperm.xlu1 %535, %v673_v2  }
  0x6d   :  { %267 = vrot.lane.b32.xlu1 %v679_v5, %s648_s24 }
  0x71   :  { %269 = vrot.lane.b32.xlu1 %v681_v6, %s648_s24 }
  0x75   :  { %294 = vrot.lane.b32.xlu1 %v681_v6, %s644_s22 }
  0x96   :  { %v95_v27 = vpop.permute.xlu1 %94  ;;  %v112_v28 = vpop.permute.xlu0 %111 }
  0x9b   :  { %v99_v31 = vpop.permute.xlu1 %98  ;;  %v120_v32 = vpop.permute.xlu0 %119 }
  0x9f   :  { %v104_v37 = vpop.permute.xlu0 %103  ;;  %v102_v38 = vpop.permute.xlu1 %101 }
  0xa0   :  { %v106_v39 = vsel %vm105_vm4, %v102_v38, %v104_v37  ;;  %v107_v40 = vsel %vm105_vm4, %v104_v37, %v102_v38  ;;  %vm415_vm4 = vcmask 1042432  }
  0xa1   :  { %v108_v41 = vmul.f32 %v466_v35, %v107_v40  ;;  %v109_v42 = vmul.f32 %v742_v36, %v106_v39  ;;  %v797_v35 = vsel %vm747_vm5, 1.0, %v649_v34  ;;  %vm418_vm5 = vcmask 1043456  }
  0xa3   :  { %v114_v43 = vmul.f32 %v112_v28, %v108_v41  ;;  %v115_v44 = vmul.f32 %v112_v28, %v109_v42  ;;  %v122_v45 = vmul.f32 %v120_v32, %v108_v41  ;;  %v123_v46 = vmul.f32 %v120_v32, %v109_v42  ;;  %v162_v47 = vpop.permute.xlu1 %161  ;;  %v170_v54 = vpop.permute.xlu0 %169 }
  0xa4   :  { %v471_v28 = vsel %vm725_vm1, 1.0, %v649_v34  ;;  %v476_v41 = vsel %vm76_vm12, 1.0, %v649_v34  ;;  %vm296_vm1 = vcmp.lt.s32.totalorder %v717_v24, 111 }
  0xa5   :  { %v116_v48 = vadd.f32 %v114_v43, %v95_v27  ;;  %v117_v49 = vadd.f32 %v115_v44, %v95_v27  ;;  %v124_v50 = vadd.f32 %v122_v45, %v99_v31  ;;  %v125_v51 = vadd.f32 %v123_v46, %v99_v31 }
  0xa6   :  { %v468_v31 = vsel %vm43_vm0, 1.0, %v649_v34  ;;  %v477_v43 = vsel %vm74_vm10, 1.0, %v649_v34  ;;  %vm271_vm0 = vcmp.lt.s32.totalorder %v717_v24, 112 }
  0xa7   :  { %v152_v59 = vpop.permute.xlu0 %151 }
  0xa8   :  { %v745_v52 = vpop.permute.xlu1 %136 }
  0xab   :  { %v187_v11 = vpop.permute.xlu0 %186 }
  0xad   :  { %v751_v55 = vpop.permute.xlu1 %144 }
  0xb0   :  { %v211_v13 = vpop.permute.xlu0 %210 }
  0xb1   :  { %v154_v60 = vpop.permute.xlu1 %153  ;;  %v213_v33 = vmul.f32 %v211_v13, %v679_v5  ;;  %v214_v39 = vmul.f32 %v211_v13, %v681_v6 }
  0xb2   :  { %v156_v61 = vsel %vm155_vm8, %v152_v59, %v154_v60  ;;  %v157_v62 = vsel %vm155_vm8, %v154_v60, %v152_v59  ;;  %vm427_vm8 = vcmask 1046528  }
  0xb3   :  { %v158_v63 = vmul.f32 %v469_v57, %v157_v62  ;;  %v159_v0 = vmul.f32 %v766_v58, %v156_v61 }
  0xb4   :  { %v177_v15 = vpop.permute.xlu0 %176 }
  0xb5   :  { %v164_v1 = vmul.f32 %v162_v47, %v158_v63  ;;  %v165_v2 = vmul.f32 %v162_v47, %v159_v0  ;;  %v769_v3 = vpop.permute.xlu1 %194  ;;  %v172_v23 = vmul.f32 %v170_v54, %v158_v63  ;;  %v173_v27 = vmul.f32 %v170_v54, %v159_v0 }
  0xb7   :  { %v166_v4 = vadd.f32 %v164_v1, %v116_v48  ;;  %v167_v7 = vadd.f32 %v165_v2, %v117_v49  ;;  %v174_v37 = vadd.f32 %v172_v23, %v124_v50  ;;  %v175_v44 = vadd.f32 %v173_v27, %v125_v51 }
  0xb8   :  { %v775_v17 = vpop.permute.xlu0 %227 }
  0xb9   :  { %v215_v50 = vadd.f32 %v213_v33, %v174_v37  ;;  %v216_v59 = vadd.f32 %v214_v39, %v175_v44 }
  0xba   :  { %v203_v8 = vpop.permute.xlu1 %202 }
  0xbb   :  { %v205_v45 = vmul.f32 %v203_v8, %v679_v5  ;;  %v206_v48 = vmul.f32 %v203_v8, %v681_v6  ;;  %v479_v5 = vsel %vm86_vm15, 1.0, %v649_v34 }
  0xbd   :  { %v777_v20 = vpop.permute.xlu0 %260  ;;  %v207_v60 = vadd.f32 %v205_v45, %v166_v4  ;;  %v208_v63 = vadd.f32 %v206_v48, %v167_v7 }
  0xbe   :  { %v127_v9 = vpop.permute.xlu1 %126 }
  0xc1   :  { %v243_v22 = vpop.permute.xlu0 %242 }
  0xc2   :  { %v129_v10 = vpop.permute.xlu1 %128 }
  0xc3   :  { %v132_v38 = vsel %vm130_vm11, %v129_v10, %v127_v9  ;;  %v131_v25 = vsel %vm130_vm11, %v127_v9, %v129_v10 }
  0xc4   :  { %v133_v49 = vmul.f32 %v468_v31, %v132_v38  ;;  %v140_v1 = vmul.f32 %v745_v52, %v131_v25  ;;  %v148_v10 = vmul.f32 %v751_v55, %v131_v25 }
  0xc5   :  { %v800_v30 = vpop.permute.xlu0 %277 }
  0xc6   :  { %v179_v12 = vpop.permute.xlu1 %178  ;;  %v139_v0 = vmul.f32 %v745_v52, %v133_v49  ;;  %v147_v2 = vmul.f32 %v751_v55, %v133_v49 }
  0xc7   :  { %v182_v29 = vsel %vm180_vm9, %v179_v12, %v177_v15  ;;  %v181_v32 = vsel %vm180_vm9, %v177_v15, %v179_v12 }
  0xc8   :  { %v183_v40 = vmul.f32 %v471_v28, %v182_v29  ;;  %v184_v46 = vmul.f32 %v742_v36, %v181_v32 }
  0xca   :  { %v771_v14 = vpop.permute.xlu1 %235  ;;  %v189_v36 = vmul.f32 %v187_v11, %v183_v40  ;;  %v311_v57 = vpop.permute.xlu0 %310  ;;  %v190_v61 = vmul.f32 %v187_v11, %v184_v46  ;;  %v197_v62 = vmul.f32 %v769_v3, %v183_v40  ;;  %v198_v34 = vmul.f32 %v769_v3, %v184_v46 }
  0xcc   :  { %v191_v12 = vadd.f32 %v189_v36, %v139_v0  ;;  %v192_v13 = vadd.f32 %v190_v61, %v140_v1  ;;  %v199_v15 = vadd.f32 %v197_v62, %v147_v2 }
  0xcf   :  { %v773_v16 = vpop.permute.xlu1 %252 }
  0xd3   :  { %v218_v18 = vpop.permute.xlu1 %217 }
  0xd7   :  { %v220_v19 = vpop.permute.xlu1 %219 }
  0xd8   :  { %v223_v47 = vsel %vm221_vm13, %v220_v19, %v218_v18  ;;  %v222_v51 = vsel %vm221_vm13, %v218_v18, %v220_v19  ;;  %v200_v18 = vadd.f32 %v198_v34, %v148_v10 }
  0xd9   :  { %v225_v53 = vmul.f32 %v766_v58, %v223_v47  ;;  %v224_v58 = vmul.f32 %v797_v35, %v222_v51 }
  0xdb   :  { %v245_v21 = vpop.permute.xlu1 %244  ;;  %v231_v4 = vmul.f32 %v775_v17, %v225_v53  ;;  %v239_v11 = vmul.f32 %v771_v14, %v225_v53  ;;  %v230_v19 = vmul.f32 %v775_v17, %v224_v58 }
  0xdc   :  { %v247_v6 = vsel %vm246_vm14, %v243_v22, %v245_v21  ;;  %v248_v54 = vsel %vm246_vm14, %v245_v21, %v243_v22  ;;  %v238_v21 = vmul.f32 %v771_v14, %v224_v58  ;;  %v293_v22 = vpop.permute.xlu0 %292 }
  0xdd   :  { %v249_v8 = vmul.f32 %v471_v28, %v247_v6  ;;  %v250_v9 = vmul.f32 %v476_v41, %v248_v54  ;;  %v233_v31 = vadd.f32 %v231_v4, %v192_v13  ;;  %v241_v32 = vadd.f32 %v239_v11, %v200_v18 }
  0xde   :  { %v232_v40 = vadd.f32 %v230_v19, %v191_v12  ;;  %v240_v41 = vadd.f32 %v238_v21, %v199_v15 }
  0xdf   :  { %v781_v26 = vpop.permute.xlu1 %285  ;;  %v255_v23 = vmul.f32 %v773_v16, %v249_v8  ;;  %v256_v27 = vmul.f32 %v773_v16, %v250_v9  ;;  %v263_v28 = vmul.f32 %v777_v20, %v249_v8  ;;  %v264_v29 = vmul.f32 %v777_v20, %v250_v9 }
  0xe1   :  { %v257_v44 = vadd.f32 %v255_v23, %v207_v60  ;;  %v258_v45 = vadd.f32 %v256_v27, %v208_v63  ;;  %v265_v46 = vadd.f32 %v263_v28, %v215_v50  ;;  %v266_v47 = vadd.f32 %v264_v29, %v216_v59 }
  0xe4   :  { %v808_v42 = vpop.permute.xlu1 %302 }
  0xe8   :  { %v268_v56 = vpop.permute.xlu1 %267 }
  0xec   :  { %v270_v7 = vpop.permute.xlu1 %269 }
  0xed   :  { %v272_v3 = vsel %vm271_vm0, %v268_v56, %v270_v7  ;;  %v273_v52 = vsel %vm271_vm0, %v270_v7, %v268_v56 }
  0xee   :  { %v275_v55 = vmul.f32 %v477_v43, %v273_v52  ;;  %v280_v37 = vmul.f32 %v800_v30, %v272_v3  ;;  %v288_v33 = vmul.f32 %v781_v26, %v272_v3 }
  0xf0   :  { %v295_v38 = vpop.permute.xlu1 %294  ;;  %v281_v17 = vmul.f32 %v800_v30, %v275_v55  ;;  %v289_v14 = vmul.f32 %v781_v26, %v275_v55  ;;  %v282_v25 = vadd.f32 %v280_v37, %v232_v40  ;;  %v290_v36 = vadd.f32 %v288_v33, %v240_v41 }
  0xf1   :  { %v297_v39 = vsel %vm296_vm1, %v293_v22, %v295_v38  ;;  %v298_v16 = vsel %vm296_vm1, %v295_v38, %v293_v22 }
  0xf2   :  { %v299_v20 = vmul.f32 %v797_v35, %v297_v39  ;;  %v300_v43 = vmul.f32 %v479_v5, %v298_v16  ;;  %v283_v51 = vadd.f32 %v281_v17, %v233_v31  ;;  %v291_v24 = vadd.f32 %v289_v14, %v241_v32 }
  0xf4   :  { %v305_v48 = vmul.f32 %v808_v42, %v299_v20  ;;  %v306_v30 = vmul.f32 %v808_v42, %v300_v43  ;;  %v313_v26 = vmul.f32 %v311_v57, %v299_v20  ;;  %v314_v49 = vmul.f32 %v311_v57, %v300_v43 }
  0xf6   :  { %v307_v53 = vadd.f32 %v305_v48, %v257_v44  ;;  %v308_v6 = vadd.f32 %v306_v30, %v258_v45  ;;  %v315_v54 = vadd.f32 %v313_v26, %v265_v46  ;;  %v316_v56 = vadd.f32 %v314_v49, %v266_v47 }
  0xf8   :  { %v317_v35 = vadd.f32 %v307_v53, %v282_v25  ;;  %v318_v5 = vadd.f32 %v308_v6, %v283_v51  ;;  %v333_v60 = vadd.f32 %v315_v54, %v290_v36  ;;  %v334_v61 = vadd.f32 %v316_v56, %v291_v24 }
  0xfa   :  { %v480_v50 = vmul.f32 -1.442695, %v317_v35  ;;  %v481_v59 = vmul.f32 -1.442695, %v318_v5  ;;  %v482_v62 = vmul.f32 -1.442695, %v333_v60 }
  0xfb   :  { %v483_v63 = vmul.f32 -1.442695, %v334_v61 }
  0xfc   :  { %537 = vpow2.f32 %v480_v50 }
  0xfd   :  { %539 = vpow2.f32 %v481_v59 }
  0xfe   :  { %541 = vpow2.f32 %v482_v62 }
  0xff   :  { %543 = vpow2.f32 %v483_v63 }
 0x109   :  { %v538_v42 = vpop.eup %537 }
 0x10a   :  { %v540_v57 = vpop.eup %539  ;;  %v325_v0 = vadd.f32 1.0, %v538_v42 }
 0x10b   :  { %v542_v34 = vpop.eup %541  ;;  %v326_v58 = vadd.f32 1.0, %v540_v57 }
 0x10c   :  { %v544_v1 = vpop.eup %543  ;;  %545 = vrcp.f32 %v325_v0  ;;  %v341_v2 = vadd.f32 1.0, %v542_v34 }
 0x10d   :  { %547 = vrcp.f32 %v326_v58  ;;  %v342_v8 = vadd.f32 1.0, %v544_v1 }
 0x10e   :  { %549 = vrcp.f32 %v341_v2 }
 0x10f   :  { %551 = vrcp.f32 %v342_v8 }
 0x119   :  { %v546_v9 = vpop.eup %545 }
 0x11a   :  { %v548_v10 = vpop.eup %547  ;;  %v864_v12 = vmul.f32 %v546_v9, %v317_v35 }
 0x11b   :  { %v550_v4 = vpop.eup %549  ;;  %v866_v11 = vmul.f32 %v548_v10, %v318_v5 }
 0x11c   :  { %v552_v7 = vpop.eup %551  ;;  %v868_v13 = vmul.f32 %v550_v4, %v333_v60  ;;  %v357_v15 = vrot.slane %v864_v12, 7  ;;  %v365_v3 = vrot.slane %v864_v12, 6  ;;  %v373_v52 = vrot.slane %v864_v12, 5 }
 0x11d   :  { %v348_v18 = vmul.f32 %v552_v7, %v334_v61  ;;  %v358_v19 = vrot.slane %v866_v11, 7  ;;  %v366_v21 = vrot.slane %v866_v11, 6  ;;  %v374_v55 = vrot.slane %v866_v11, 5 }
 0x11e   :  { %v351_v22 = vrot.slane %v868_v13, 7  ;;  %v361_v23 = vrot.slane %v868_v13, 6  ;;  %v369_v27 = vrot.slane %v868_v13, 5  ;;  %v377_v28 = vrot.slane %v868_v13, 4 }
 0x11f   :  { %v352_v29 = vrot.slane %v348_v18, 7  ;;  %v362_v31 = vrot.slane %v348_v18, 6  ;;  %v370_v32 = vrot.slane %v348_v18, 5  ;;  %v378_v37 = vrot.slane %v348_v18, 4 }
 0x120   :  { %v381_v33 = vrot.slane %v864_v12, 4  ;;  %v382_v38 = vrot.slane %v866_v11, 4  ;;  %v385_v17 = vrot.slane %v868_v13, 3  ;;  %v386_v14 = vrot.slane %v348_v18, 3 }
 0x121   :  { %v389_v39 = vrot.slane %v864_v12, 3  ;;  %v390_v16 = vrot.slane %v866_v11, 3  ;;  %v393_v40 = vrot.slane %v868_v13, 2  ;;  %v394_v41 = vrot.slane %v348_v18, 2 }
 0x122   :  { %v397_v20 = vrot.slane %v864_v12, 2  ;;  %v398_v43 = vrot.slane %v866_v11, 2  ;;  %v401_v44 = vrot.slane %v868_v13, 1  ;;  %v402_v45 = vrot.slane %v348_v18, 1 }
 0x123   :  { %v405_v46 = vrot.slane %v864_v12, 1  ;;  %v406_v47 = vrot.slane %v866_v11, 1  ;;  %v410_v48 = vsel %vm409_vm2, %v864_v12, %v351_v22  ;;  %v411_v30 = vsel %vm409_vm2, %v866_v11, %v352_v29 }
 0x124   :  { %v413_v26 = vsel %vm412_vm3, %v410_v48, %v357_v15  ;;  %v414_v49 = vsel %vm412_vm3, %v411_v30, %v358_v19  ;;  %v430_v25 = vsel %vm409_vm2, %v381_v33, %v385_v17  ;;  %v431_v51 = vsel %vm409_vm2, %v382_v38, %v386_v14 }
 0x125   :  { %v416_v36 = vsel %vm415_vm4, %v413_v26, %v361_v23  ;;  %v417_v24 = vsel %vm415_vm4, %v414_v49, %v362_v31  ;;  %v432_v53 = vsel %vm412_vm3, %v430_v25, %v389_v39  ;;  %v433_v6 = vsel %vm412_vm3, %v431_v51, %v390_v16 }
 0x126   :  { %v419_v54 = vsel %vm418_vm5, %v416_v36, %v365_v3  ;;  %v420_v56 = vsel %vm418_vm5, %v417_v24, %v366_v21  ;;  %v434_v35 = vsel %vm415_vm4, %v432_v53, %v393_v40  ;;  %v435_v5 = vsel %vm415_vm4, %v433_v6, %v394_v41 }
 0x127   :  { %v422_v60 = vsel %vm421_vm6, %v419_v54, %v369_v27  ;;  %v423_v61 = vsel %vm421_vm6, %v420_v56, %v370_v32  ;;  %v436_v50 = vsel %vm418_vm5, %v434_v35, %v397_v20  ;;  %v437_v59 = vsel %vm418_vm5, %v435_v5, %v398_v43 }
 0x128   :  { %v425_v62 = vsel %vm424_vm7, %v422_v60, %v373_v52  ;;  %v426_v63 = vsel %vm424_vm7, %v423_v61, %v374_v55  ;;  %v438_v42 = vsel %vm421_vm6, %v436_v50, %v401_v44  ;;  %v439_v57 = vsel %vm421_vm6, %v437_v59, %v402_v45 }
 0x129   :  { %v428_v0 = vsel %vm427_vm8, %v425_v62, %v377_v28  ;;  %v429_v34 = vsel %vm427_vm8, %v426_v63, %v378_v37  ;;  %v440_v58 = vsel %vm424_vm7, %v438_v42, %v405_v46  ;;  %v441_v1 = vsel %vm424_vm7, %v439_v57, %v406_v47 }
 0x12a   :  { %v442_v2 = vsel %vm427_vm8, %v440_v58, %v868_v13  ;;  %v443_v8 = vsel %vm427_vm8, %v441_v1, %v348_v18  ;;  %444 = vst [vmem:[#allocation7] sm:$0xff] %v428_v0  ;;  %445 = vst [vmem:[#allocation7 + $0x8] sm:$0xff] %v429_v34 }
 0x12b   :  { %446 = vst [vmem:[#allocation7 + $0x10] sm:$0xff] %v442_v2  ;;  %447 = vst [vmem:[#allocation7 + $0x18] sm:$0xff] %v443_v8 }
 0x12c   :  { %604 = shalt.err (!%p601_p0)
}
 0x12d   :  { %s651_s28 = smov 256  }
 0x12e   :  { %459 = dma.vmem_to_hbm [thread:$0]  %s454_s26, 512, %s928_s2, [#allocation4], %s651_s28, %s651_s28, %s638_s20  }
 0x12f   :  { %617 = dma.done.wait [#allocation4], 512  }
 0x130   :  { %618 = vsyncadd [#allocation4], 4294966784 }
 0x131   :  { %463 = vsyncpa [#allocation3], 1 }
 0x132   :  { %464 = vsyncpa [#allocation6], 1 }
 0x133   :  { %465 = vsyncpa [#allocation4], 1 }

</bundles_post_ra>
